<compile_context>
chip_gen: v6e
topology: v6e:2x2x1
jax: 0.10.0
libtpu: 0.0.40
codegen_flags: <defaults>
</compile_context>

<pallas_src>
import functools

import jax
import jax.numpy as jnp
from jax.experimental import pallas as pl
from jax.experimental.pallas import tpu as pltpu

_LANE = 128
_MAX_TM = 2048      # batch tile cap (perf review: sweep 1024-4096)
_SPLIT_MIN_B = 512  # above this, force grid >= 2 so v7x's 2 TCs both get work


def _round_up(n, m):
    return ((n + m - 1) // m) * m


def _mlp_kernel(x_ref, w1_ref, b1_ref, w2_ref, b2_ref, w3_ref, b3_ref, o_ref):
    # bf16 operands feed the MXU; accumulate / bias / ReLU in f32 (v5e-safe).
    x = x_ref[...].astype(jnp.bfloat16)

    h1 = jnp.dot(x, w1_ref[...], preferred_element_type=jnp.float32) + b1_ref[...]
    h1 = jnp.maximum(h1, 0.0)

    h2 = jnp.dot(h1.astype(jnp.bfloat16), w2_ref[...],
                 preferred_element_type=jnp.float32) + b2_ref[...]
    h2 = jnp.maximum(h2, 0.0)

    out = jnp.dot(h2.astype(jnp.bfloat16), w3_ref[...],
                  preferred_element_type=jnp.float32) + b3_ref[...]

    # Only the first out_size of the 128 padded lanes are real: store just
    # those columns (block last-dim == full output array last-dim, so it
    # compiles).  Cuts output HBM writeback ~32x vs the padded f32 slab and
    # removes the wrapper lane-slice round trip.
    o_ref[...] = out[:, : o_ref.shape[-1]].astype(o_ref.dtype)


def prepare_params(params):
    """One-time layout prep (call once after init / checkpoint load).

    PyTorch convention in:  w (out, in), b (out,)
    Kernel convention out:  w (in, out_padded) bf16, b (1, out_padded) f32,
    with every output feature dim zero-padded to a multiple of 128 lanes
    (NOT 256 -- kernel is DMA/overhead-bound, not MXU-bound).  Zero padding is
    numerically inert (ReLU(0)=0, zero rows/cols add nothing).
    """
    w1, b1 = params["w1"], params["b1"]
    w2, b2 = params["w2"], params["b2"]
    w3, b3 = params["w3"], params["b3"]

    in_size = w1.shape[1]
    h1p = _round_up(w1.shape[0], _LANE)
    h2p = _round_up(w2.shape[0], _LANE)
    op = _round_up(w3.shape[0], _LANE)

    def pad_w(w_t, rows, cols):  # w_t is already (in, out)
        return jnp.pad(w_t, ((0, rows - w_t.shape[0]), (0, cols - w_t.shape[1])))

    def pad_b(b, cols):
        return jnp.pad(b, (0, cols - b.shape[0]))[None, :].astype(jnp.float32)

    return {
        "w1": pad_w(w1.T, in_size, h1p).astype(jnp.bfloat16),
        "b1": pad_b(b1, h1p),
        "w2": pad_w(w2.T, h1p, h2p).astype(jnp.bfloat16),
        "b2": pad_b(b2, h2p),
        "w3": pad_w(w3.T, h2p, op).astype(jnp.bfloat16),
        "b3": pad_b(b3, op),
    }


@functools.partial(jax.jit, static_argnames=("out_size",))
def linear_qnet_forward(x, prepared, out_size):
    """x: (B, input_size) f32; prepared: output of prepare_params()."""
    w1, b1 = prepared["w1"], prepared["b1"]
    w2, b2 = prepared["w2"], prepared["b2"]
    w3, b3 = prepared["w3"], prepared["b3"]

    B, in_size = x.shape
    h1p, h2p, op = w1.shape[1], w2.shape[1], w3.shape[1]

    # Batch tiling:
    #   B <= 512            : single grid step (tiny-batch / inference path).
    #   B  > 512            : even grid of >= 2 steps (feeds both v7x TCs),
    #                         tile <= _MAX_TM, near-minimal row padding.
    if B <= _SPLIT_MIN_B:
        tm, bp, ng = B, B, 1
    else:
        ng = max(2, 2 * pl.cdiv(B, 2 * _MAX_TM))   # even, >= 2
        tm = _round_up(pl.cdiv(B, ng), 8)          # sublane-aligned tile
        bp = ng * tm
        if bp != B:
            x = jnp.pad(x, ((0, bp - B), (0, 0)))
    grid = (ng,)

    # Weights/biases: full block, constant index_map -> loaded once, VMEM-resident.
    const = lambda a: pl.BlockSpec(a.shape, lambda i: (0,) * a.ndim)

    flops = 2 * bp * (in_size * h1p + h1p * h2p + h2p * op)
    bytes_accessed = (
        bp * in_size * 4 + bp * out_size * 4
        + (w1.size + w2.size + w3.size) * 2
        + (b1.size + b2.size + b3.size) * 4
    )

    out = pl.pallas_call(
        _mlp_kernel,
        out_shape=jax.ShapeDtypeStruct((bp, out_size), x.dtype),
        grid=grid,
        in_specs=[
            pl.BlockSpec((tm, in_size), lambda i: (i, 0)),
            const(w1), const(b1), const(w2), const(b2), const(w3), const(b3),
        ],
        out_specs=pl.BlockSpec((tm, out_size), lambda i: (i, 0)),
        compiler_params=pltpu.CompilerParams(
            dimension_semantics=("parallel",),   # shards batch over v7x's 2 TCs
            vmem_limit_bytes=32 * 1024 * 1024,   # explicit; safe on v7x 64 MiB
        ),
        cost_estimate=pl.CostEstimate(
            flops=flops, transcendentals=0, bytes_accessed=bytes_accessed),
    )(x, w1, b1, w2, b2, w3, b3)

    # Only a row slice remains (padded batch rows hold bias-only garbage and
    # must not be consumed); output lanes are already exact.
    return out[:B] if bp != B else out


def init_params(key, input_size, hidden_size1, hidden_size2, output_size):
    """PyTorch nn.Linear default init: U(-1/sqrt(fan_in), 1/sqrt(fan_in))."""
    ks = jax.random.split(key, 6)

    def lin(kw, kb, fan_in, fan_out):
        bound = 1.0 / jnp.sqrt(jnp.float32(fan_in))
        w = jax.random.uniform(kw, (fan_out, fan_in), jnp.float32, -bound, bound)
        b = jax.random.uniform(kb, (fan_out,), jnp.float32, -bound, bound)
        return w, b

    w1, b1 = lin(ks[0], ks[1], input_size, hidden_size1)
    w2, b2 = lin(ks[2], ks[3], hidden_size1, hidden_size2)
    w3, b3 = lin(ks[4], ks[5], hidden_size2, output_size)
    return {"w1": w1, "b1": b1, "w2": w2, "b2": b2, "w3": w3, "b3": b3}


def reference_forward(x, p):
    h1 = jnp.maximum(x @ p["w1"].T + p["b1"], 0.0)
    h2 = jnp.maximum(h1 @ p["w2"].T + p["b2"], 0.0)
    return h2 @ p["w3"].T + p["b3"]


# TODO(synk): save/load/save_checkpoint/load_checkpoint are host-side torch
# file I/O with no kernel equivalent; persist `params` with your own
# serialization and re-run prepare_params() after loading.

if __name__ == "__main__":
    key = jax.random.PRNGKey(0)
    k_x, k_p, k_xb = jax.random.split(key, 3)

    # Small Q-network shapes (snake-game style state -> action values).
    batch, input_size, hidden1, hidden2, output_size = 8, 11, 32, 32, 4

    params = init_params(k_p, input_size, hidden1, hidden2, output_size)
    prepared = prepare_params(params)  # one-time transpose/pad/bf16 cast

    # Tiny-batch inference path (grid=(1,)).
    x = jax.random.normal(k_x, (batch, input_size), jnp.float32)
    out = jax.block_until_ready(linear_qnet_forward(x, prepared, output_size))
    ref = reference_forward(x, params)
    assert out.shape == (batch, output_size)
    # bf16 MXU operands -> compare against f32 reference at bf16-level tolerance
    # (intentional; do not tighten).
    assert jnp.allclose(out, ref, atol=5e-2, rtol=5e-2), "mismatch vs reference (small batch)"

    # Multi-tile path: B > 512 -> even grid >= 2 steps, padded rows sliced off.
    xb = jax.random.normal(k_xb, (1030, input_size), jnp.float32)
    outb = jax.block_until_ready(linear_qnet_forward(xb, prepared, output_size))
    refb = reference_forward(xb, params)
    assert outb.shape == (1030, output_size)
    assert jnp.allclose(outb, refb, atol=5e-2, rtol=5e-2), "mismatch vs reference (large batch)"

    print("KERNEL_OK")
</pallas_src>

<mosaic_0001>
module attributes {stable_mosaic.version = 11 : i64} {
  func.func @_mlp_kernel(%arg0: i32, %arg1: memref<8x11xf32, #tpu.memory_space<vmem>>, %arg2: memref<11x128xbf16, #tpu.memory_space<vmem>>, %arg3: memref<1x128xf32, #tpu.memory_space<vmem>>, %arg4: memref<128x128xbf16, #tpu.memory_space<vmem>>, %arg5: memref<1x128xf32, #tpu.memory_space<vmem>>, %arg6: memref<128x128xbf16, #tpu.memory_space<vmem>>, %arg7: memref<1x128xf32, #tpu.memory_space<vmem>>, %arg8: memref<8x4xf32, #tpu.memory_space<vmem>>) attributes {dimension_semantics = [#tpu.dimension_semantics<parallel>], iteration_bounds = array<i64: 1>, scalar_prefetch = 0 : i64, scratch_operands = 0 : i64, tpu.core_type = #tpu.core_type<tc>, window_params = [{transform_indices = @transform_0, window_bounds = array<i64: 8, 11>}, {pipeline_mode = #tpu.pipeline_mode<synchronous>, transform_indices = @transform_1, window_bounds = array<i64: 11, 128>}, {pipeline_mode = #tpu.pipeline_mode<synchronous>, transform_indices = @transform_2, window_bounds = array<i64: 1, 128>}, {pipeline_mode = #tpu.pipeline_mode<synchronous>, transform_indices = @transform_3, window_bounds = array<i64: 128, 128>}, {pipeline_mode = #tpu.pipeline_mode<synchronous>, transform_indices = @transform_4, window_bounds = array<i64: 1, 128>}, {pipeline_mode = #tpu.pipeline_mode<synchronous>, transform_indices = @transform_5, window_bounds = array<i64: 128, 128>}, {pipeline_mode = #tpu.pipeline_mode<synchronous>, transform_indices = @transform_6, window_bounds = array<i64: 1, 128>}, {transform_indices = @transform_7, window_bounds = array<i64: 8, 4>}]} {
    %c0 = arith.constant 0 : index
    %c0_0 = arith.constant 0 : index
    %0 = vector.load %arg1[%c0, %c0_0] : memref<8x11xf32, #tpu.memory_space<vmem>>, vector<8x11xf32>
    %1 = arith.truncf %0 : vector<8x11xf32> to vector<8x11xbf16>
    %c0_1 = arith.constant 0 : index
    %c0_2 = arith.constant 0 : index
    %2 = vector.load %arg2[%c0_1, %c0_2] : memref<11x128xbf16, #tpu.memory_space<vmem>>, vector<11x128xbf16>
    %cst = arith.constant dense<0.000000e+00> : vector<8x128xf32>
    %3 = tpu.matmul %1, %2, %cst {dimension_numbers = #tpu.dot_dimension_numbers<[1], [0], [0], [1], [0, 0, 1, 1], [], []>} : vector<8x11xbf16>, vector<11x128xbf16>, vector<8x128xf32> -> vector<8x128xf32>
    %c0_3 = arith.constant 0 : index
    %c0_4 = arith.constant 0 : index
    %4 = vector.load %arg3[%c0_3, %c0_4] : memref<1x128xf32, #tpu.memory_space<vmem>>, vector<1x128xf32>
    %5 = vector.broadcast %4 : vector<1x128xf32> to vector<8x128xf32>
    %6 = arith.addf %3, %5 : vector<8x128xf32>
    %cst_5 = arith.constant 0.000000e+00 : f32
    %7 = vector.broadcast %cst_5 : f32 to vector<8x128xf32>
    %8 = arith.maximumf %6, %7 : vector<8x128xf32>
    %9 = arith.truncf %8 : vector<8x128xf32> to vector<8x128xbf16>
    %c0_6 = arith.constant 0 : index
    %c0_7 = arith.constant 0 : index
    %10 = vector.load %arg4[%c0_6, %c0_7] : memref<128x128xbf16, #tpu.memory_space<vmem>>, vector<128x128xbf16>
    %cst_8 = arith.constant dense<0.000000e+00> : vector<8x128xf32>
    %11 = tpu.matmul %9, %10, %cst_8 {dimension_numbers = #tpu.dot_dimension_numbers<[1], [0], [0], [1], [0, 0, 1, 1], [], []>} : vector<8x128xbf16>, vector<128x128xbf16>, vector<8x128xf32> -> vector<8x128xf32>
    %c0_9 = arith.constant 0 : index
    %c0_10 = arith.constant 0 : index
    %12 = vector.load %arg5[%c0_9, %c0_10] : memref<1x128xf32, #tpu.memory_space<vmem>>, vector<1x128xf32>
    %13 = vector.broadcast %12 : vector<1x128xf32> to vector<8x128xf32>
    %14 = arith.addf %11, %13 : vector<8x128xf32>
    %cst_11 = arith.constant 0.000000e+00 : f32
    %15 = vector.broadcast %cst_11 : f32 to vector<8x128xf32>
    %16 = arith.maximumf %14, %15 : vector<8x128xf32>
    %17 = arith.truncf %16 : vector<8x128xf32> to vector<8x128xbf16>
    %c0_12 = arith.constant 0 : index
    %c0_13 = arith.constant 0 : index
    %18 = vector.load %arg6[%c0_12, %c0_13] : memref<128x128xbf16, #tpu.memory_space<vmem>>, vector<128x128xbf16>
    %cst_14 = arith.constant dense<0.000000e+00> : vector<8x128xf32>
    %19 = tpu.matmul %17, %18, %cst_14 {dimension_numbers = #tpu.dot_dimension_numbers<[1], [0], [0], [1], [0, 0, 1, 1], [], []>} : vector<8x128xbf16>, vector<128x128xbf16>, vector<8x128xf32> -> vector<8x128xf32>
    %c0_15 = arith.constant 0 : index
    %c0_16 = arith.constant 0 : index
    %20 = vector.load %arg7[%c0_15, %c0_16] : memref<1x128xf32, #tpu.memory_space<vmem>>, vector<1x128xf32>
    %21 = vector.broadcast %20 : vector<1x128xf32> to vector<8x128xf32>
    %22 = arith.addf %19, %21 : vector<8x128xf32>
    %23 = vector.extract_strided_slice %22 {offsets = [0, 0], sizes = [8, 4], strides = [1, 1]} : vector<8x128xf32> to vector<8x4xf32>
    %c0_17 = arith.constant 0 : index
    %c0_18 = arith.constant 0 : index
    %24 = vector.load %arg8[%c0_17, %c0_18] : memref<8x4xf32, #tpu.memory_space<vmem>>, vector<8x4xf32>
    tpu.vector_store %arg8[%c0_17, %c0_18], %23 {strides = array<i32>} : memref<8x4xf32, #tpu.memory_space<vmem>>, vector<8x4xf32>,
    return
  }
  func.func @transform_0(%arg0: i32) -> (i32, i32) {
    %c0_i32 = arith.constant 0 : i32
    %c0_i32_0 = arith.constant 0 : i32
    return %arg0, %c0_i32 : i32, i32
  }
  func.func @transform_1(%arg0: i32) -> (i32, i32) {
    %c0_i32 = arith.constant 0 : i32
    %c0_i32_0 = arith.constant 0 : i32
    %c0_i32_1 = arith.constant 0 : i32
    return %c0_i32, %c0_i32_0 : i32, i32
  }
  func.func @transform_2(%arg0: i32) -> (i32, i32) {
    %c0_i32 = arith.constant 0 : i32
    %c0_i32_0 = arith.constant 0 : i32
    %c0_i32_1 = arith.constant 0 : i32
    return %c0_i32, %c0_i32_0 : i32, i32
  }
  func.func @transform_3(%arg0: i32) -> (i32, i32) {
    %c0_i32 = arith.constant 0 : i32
    %c0_i32_0 = arith.constant 0 : i32
    %c0_i32_1 = arith.constant 0 : i32
    return %c0_i32, %c0_i32_0 : i32, i32
  }
  func.func @transform_4(%arg0: i32) -> (i32, i32) {
    %c0_i32 = arith.constant 0 : i32
    %c0_i32_0 = arith.constant 0 : i32
    %c0_i32_1 = arith.constant 0 : i32
    return %c0_i32, %c0_i32_0 : i32, i32
  }
  func.func @transform_5(%arg0: i32) -> (i32, i32) {
    %c0_i32 = arith.constant 0 : i32
    %c0_i32_0 = arith.constant 0 : i32
    %c0_i32_1 = arith.constant 0 : i32
    return %c0_i32, %c0_i32_0 : i32, i32
  }
  func.func @transform_6(%arg0: i32) -> (i32, i32) {
    %c0_i32 = arith.constant 0 : i32
    %c0_i32_0 = arith.constant 0 : i32
    %c0_i32_1 = arith.constant 0 : i32
    return %c0_i32, %c0_i32_0 : i32, i32
  }
  func.func @transform_7(%arg0: i32) -> (i32, i32) {
    %c0_i32 = arith.constant 0 : i32
    %c0_i32_0 = arith.constant 0 : i32
    return %arg0, %c0_i32 : i32, i32
  }
}

</mosaic_0001>

<bundles_post_ra>
// kernel: linear_qnet_forward.1
= control target key start
LH: loop header
LB: loop body
LE: loop exit
PB: predicated region body
PF: predicated region fallthrough
CT: control target
= control target key end

     0   :  { %12 = vsyncpa [#allocation3], 0  ;;  %s686_s0 = inlined_call_operand.hbm [shape: f32[8,11], index: 0, kind: input, shape index: {}]   ;;  %s687_s1 = inlined_call_operand.hbm [shape: bf16[11,128], index: 1, kind: input, shape index: {}]   ;;  %s688_s2 = inlined_call_operand.vmem [shape: f32[1,128], index: 2, kind: input, shape index: {}]   ;;  %s689_s3 = inlined_call_operand.hbm [shape: bf16[128,128], index: 3, kind: input, shape index: {}]   ;;  %s690_s4 = inlined_call_operand.vmem [shape: f32[1,128], index: 4, kind: input, shape index: {}]   ;;  %s691_s5 = inlined_call_operand.hbm [shape: bf16[128,128], index: 5, kind: input, shape index: {}]   ;;  %s692_s6 = inlined_call_operand.vmem [shape: f32[1,128], index: 6, kind: input, shape index: {}]   ;;  %s693_s7 = inlined_call_operand.vmem [shape: f32[8,4], index: 7, kind: output, shape index: {}]  }
   0x1   :  { %13 = vsyncpa [#allocation5], 0 }
   0x2   :  { %14 = vsyncpa [#allocation8], 0  ;;  %s581_s24 = smov [#allocation4]  }
   0x3   :  { %s30_s25 = sshll.u32 %s581_s24, 4  ;;  %s31_s25 = int_to_ptr.vmem [resolvable:$true] %s30_s25 }
   0x4   :  { %s503_s26 = scalar_lea.vmem %s31_s25, 128  ;;  %p508_p1 = scmp.lt.s32.totalorder %s31_s25, %s31_s25 }
   0x5   :  { %p504_p0 = scmp.ne.s32.totalorder %s31_s25, %s503_s26  ;;  %p509_p2 = scmp.lt.s32.totalorder %s503_s26, %s503_s26 }
   0x7   :  { %p510_p3 = por %p509_p2, %p508_p1 }
   0x9   :  { %p511_p4 = pnand %p510_p3, %p504_p0 }
   0xb   :  { %514 = shalt.err (!%p511_p4)
}
   0xc   :  { %s582_s27 = smov 64   ;;  %s583_s28 = smov 4  }
   0xd   :  { %36 = dma.hbm_to_vmem [thread:$0]  %s687_s1, 128, %s31_s25, [#allocation5], %s582_s27, %s582_s27, %s583_s28  }
   0xe   :  { %s584_s8 = smov [#allocation2]   ;;  %s585_s10 = smov [#allocation6]  }
   0xf   :  { %s21_s9 = sshll.u32 %s584_s8, 4  ;;  %s44_s11 = sshll.u32 %s585_s10, 4  ;;  %s22_s9 = int_to_ptr.vmem [resolvable:$true] %s21_s9  ;;  %s45_s11 = int_to_ptr.vmem [resolvable:$true] %s44_s11 }
  0x10   :  { %s523_s12 = scalar_lea.vmem %s22_s9, 128  ;;  %p528_p6 = scmp.lt.s32.totalorder %s22_s9, %s22_s9 }
  0x11   :  { %p524_p5 = scmp.ne.s32.totalorder %s22_s9, %s523_s12  ;;  %p529_p7 = scmp.lt.s32.totalorder %s523_s12, %s523_s12 }
  0x13   :  { %p530_p8 = por %p529_p7, %p528_p6 }
  0x15   :  { %p531_p9 = pnand %p530_p8, %p524_p5 }
  0x17   :  { %534 = shalt.err (!%p531_p9)
}
  0x18   :  { %24 = dma.hbm_to_vmem [thread:$0]  %s686_s0, 128, %s22_s9, [#allocation3]  }
  0x19   :  { %s543_s15 = scalar_lea.vmem %s45_s11, 1024  ;;  %p548_p11 = scmp.lt.s32.totalorder %s45_s11, %s45_s11 }
  0x1a   :  { %p544_p10 = scmp.ne.s32.totalorder %s45_s11, %s543_s15  ;;  %p549_p12 = scmp.lt.s32.totalorder %s543_s15, %s543_s15 }
  0x1c   :  { %p550_p13 = por %p549_p12, %p548_p11 }
  0x1e   :  { %p551_p0 = pnand %p550_p13, %p544_p10 }
  0x20   :  { %554 = shalt.err (!%p551_p0)
}
  0x21   :  { %50 = dma.hbm_to_vmem [thread:$0]  %s689_s3, 1024, %s45_s11, [#allocation5], %s582_s27, %s582_s27, %s583_s28  }
  0x22   :  { %s586_s17 = smov [#allocation7]  }
  0x23   :  { %s58_s18 = sshll.u32 %s586_s17, 4  ;;  %s59_s18 = int_to_ptr.vmem [resolvable:$true] %s58_s18 }
  0x24   :  { %s563_s19 = scalar_lea.vmem %s59_s18, 1024  ;;  %p568_p2 = scmp.lt.s32.totalorder %s59_s18, %s59_s18 }
  0x25   :  { %p564_p1 = scmp.ne.s32.totalorder %s59_s18, %s563_s19  ;;  %p569_p3 = scmp.lt.s32.totalorder %s563_s19, %s563_s19 }
  0x27   :  { %p570_p4 = por %p569_p3, %p568_p2 }
  0x29   :  { %p571_p5 = pnand %p570_p4, %p564_p1 }
  0x2b   :  { %574 = shalt.err (!%p571_p5)
}
  0x2c   :  { %64 = dma.hbm_to_vmem [thread:$0]  %s691_s5, 1024, %s59_s18, [#allocation8], %s582_s27, %s582_s27, %s583_s28  }
  0x2d   :  { %575 = dma.done.wait [#allocation3], 128  }
  0x2e   :  { %576 = vsyncadd [#allocation3], 4294967168 }
  0x2f   :  { %577 = dma.done.wait [#allocation5], 1152  }
  0x30   :  { %578 = vsyncadd [#allocation5], 4294966144 }
  0x31   :  { %579 = dma.done.wait [#allocation8], 1024  }
  0x32   :  { %580 = vsyncadd [#allocation8], 4294966272  ;;  %vm100_vm0 = vcmask 1044480   ;;  %v587_v0 = vmov 0.0   ;;  %vm588_vm1 = vmmov 0   ;;  %vm101_vm2 = vcmask 1045504  }
  0x33   :  { %423 = vmatprep.subr.bf16.mxu0 %v587_v0  ;;  %429 = vmatprep.subr.bf16.mxu1 %v587_v0  ;;  %v589_v1 = vmov 65535   ;;  %v478_v4 = vld [vmem:[#allocation4] sm:$0x3f]   ;;  %v80_v5 = vld [vmem:[#allocation2] sm:$0xff]  ;;  %vm96_vm3 = vcmask 89088   ;;  %v481_v10 = vld [vmem:[#allocation6 + $0x28] sm:$0xff]  }
  0x34   :  { %425 = vmatprep.mubr.msk.bf16.mxu0 %vm588_vm1, %v587_v0  ;;  %445 = vmatprep.mubr.msk.bf16.mxu1 %vm588_vm1, %v587_v0  ;;  %v102_v2 = vsel %vm100_vm0, 4294967295, %v589_v1  ;;  %v479_v7 = vld [vmem:[#allocation6 + $0x38] sm:$0xff]   ;;  %v81_v8 = vpack.c.bf16 %v80_v5, %v80_v5  ;;  %v480_v9 = vld [vmem:[#allocation6 + $0x30] sm:$0xff]   ;;  %v482_v11 = vld [vmem:[#allocation6 + $0x20] sm:$0xff]   ;;  %vm373_vm4 = vcmask 31744  }
  0x35   :  { %v103_v3 = vsel %vm101_vm2, %v102_v2, 0  ;;  %430 = vmatpush3.bf16.msra.mxu1 %v479_v7  ;;  %v483_v12 = vld [vmem:[#allocation6 + $0x18] sm:$0xff]   ;;  %v484_v13 = vld [vmem:[#allocation6 + $0x10] sm:$0xff]   ;;  %v485_v14 = vld [vmem:[#allocation6 + $0x8] sm:$0xff]  }
  0x36   :  { %v105_v6 = vand.u32 %v478_v4, %v103_v3  ;;  %431 = vmatprep.subr.bf16.mxu1 %v587_v0  ;;  %v486_v15 = vld [vmem:[#allocation6] sm:$0xff]   ;;  %v487_v16 = vld [vmem:[#allocation7 + $0x38] sm:$0xff]   ;;  %v488_v17 = vld [vmem:[#allocation7 + $0x30] sm:$0xff]  }
  0x37   :  { %v489_v18 = vld [vmem:[#allocation7 + $0x28] sm:$0xff]   ;;  %v490_v19 = vld [vmem:[#allocation7 + $0x20] sm:$0xff]   ;;  %v491_v20 = vld [vmem:[#allocation7 + $0x18] sm:$0xff]  }
  0x38   :  { %424 = vmatpush3.bf16.msra.mxu0 %v105_v6  ;;  %v492_v21 = vld [vmem:[#allocation7 + $0x10] sm:$0xff]   ;;  %v493_v30 = vld [vmem:[#allocation7 + $0x8] sm:$0xff]   ;;  %v494_v31 = vld [vmem:[#allocation7] sm:$0xff]  }
  0x39   :  { %449 = vmatprep.subr.bf16.mxu0 %v587_v0  ;;  %432 = vmatpush3.bf16.msra.mxu1 %v480_v9  ;;  %v382_v22 = vld [vmem:[%s688_s2] ss:$0 sm:$0xff] }
  0x3a   :  { %433 = vmatprep.subr.bf16.mxu1 %v587_v0  ;;  %v385_v32 = vld [vmem:[%s690_s4] ss:$0 sm:$0xff] }
  0x3b   :  { %426 = vmatmul.mubr.msk.bf16.vlgmr.msra.gmra.mxu0 %vm96_vm3, %v81_v8  ;;  %v394_v40 = vld [vmem:[%s692_s6] ss:$0 sm:$0xff] }
  0x3c   :  { %465 = vmatprep.mubr.msk.bf16.mxu0 %vm588_vm1, %v587_v0  ;;  %450 = vmatpush3.bf16.msra.mxu0 %v487_v16 }
  0x3d   :  { %434 = vmatpush3.bf16.msra.mxu1 %v481_v10  ;;  %451 = vmatprep.subr.bf16.mxu0 %v587_v0 }
  0x3e   :  { %435 = vmatprep.subr.bf16.mxu1 %v587_v0 }
  0x40   :  { %452 = vmatpush3.bf16.msra.mxu0 %v488_v17 }
  0x41   :  { %436 = vmatpush3.bf16.msra.mxu1 %v482_v11  ;;  %453 = vmatprep.subr.bf16.mxu0 %v587_v0 }
  0x42   :  { %437 = vmatprep.subr.bf16.mxu1 %v587_v0 }
  0x44   :  { %454 = vmatpush3.bf16.msra.mxu0 %v489_v18 }
  0x45   :  { %438 = vmatpush3.bf16.msra.mxu1 %v483_v12  ;;  %455 = vmatprep.subr.bf16.mxu0 %v587_v0 }
  0x46   :  { %439 = vmatprep.subr.bf16.mxu1 %v587_v0 }
  0x48   :  { %456 = vmatpush3.bf16.msra.mxu0 %v490_v19 }
  0x49   :  { %440 = vmatpush3.bf16.msra.mxu1 %v484_v13  ;;  %457 = vmatprep.subr.bf16.mxu0 %v587_v0 }
  0x4a   :  { %441 = vmatprep.subr.bf16.mxu1 %v587_v0 }
  0x4c   :  { %458 = vmatpush3.bf16.msra.mxu0 %v491_v20 }
  0x4d   :  { %442 = vmatpush3.bf16.msra.mxu1 %v485_v14  ;;  %459 = vmatprep.subr.bf16.mxu0 %v587_v0 }
  0x4e   :  { %443 = vmatprep.subr.bf16.mxu1 %v587_v0 }
  0x50   :  { %460 = vmatpush3.bf16.msra.mxu0 %v492_v21 }
  0x51   :  { %444 = vmatpush3.bf16.msra.mxu1 %v486_v15  ;;  %461 = vmatprep.subr.bf16.mxu0 %v587_v0 }
  0x54   :  { %462 = vmatpush3.bf16.msra.mxu0 %v493_v30 }
  0x55   :  { %463 = vmatprep.subr.bf16.mxu0 %v587_v0 }
  0x58   :  { %464 = vmatpush3.bf16.msra.mxu0 %v494_v31 }
  0xfb   :  { %v141_v23 = vpop.f32.mrf.mxu0 }
  0xfc   :  { %v142_v24 = vadd.f32 %v382_v22, %v141_v23 }
  0xfd   :  { %v427_v25 = vpop.f32.mrf.mxu0 }
  0xfe   :  { %v147_v26 = vmax.f32 %v142_v24, 0.0 }
  0xff   :  { %v144_v27 = vpop.f32.mrf.mxu0 }
 0x100   :  { %v148_v28 = vpack.c.bf16 %v147_v26, %v147_v26 }
 0x101   :  { %v428_v29 = vpop.f32.mrf.mxu0 }
 0x102   :  { %446 = vmatmul.mubr.bf16.vlgmr.msra.gmra.mxu1 %v148_v28 }
 0x1c2   :  { %v254_v33 = vpop.f32.mrf.mxu1 }
 0x1c3   :  { %v255_v34 = vadd.f32 %v385_v32, %v254_v33 }
 0x1c4   :  { %v447_v35 = vpop.f32.mrf.mxu1 }
 0x1c5   :  { %v260_v36 = vmax.f32 %v255_v34, 0.0 }
 0x1c6   :  { %v257_v37 = vpop.f32.mrf.mxu1 }
 0x1c7   :  { %v261_v38 = vpack.c.bf16 %v260_v36, %v260_v36 }
 0x1c8   :  { %v448_v39 = vpop.f32.mrf.mxu1 }
 0x1c9   :  { %466 = vmatmul.mubr.bf16.vlgmr.msra.gmra.mxu0 %v261_v38 }
 0x289   :  { %v367_v41 = vpop.f32.mrf.mxu0 }
 0x28a   :  { %v368_v42 = vadd.f32 %v394_v40, %v367_v41 }
 0x28b   :  { %v467_v43 = vpop.f32.mrf.mxu0 }
 0x28c   :  { %374 = vst.msk [vmem:[%s693_s7] sm:$0xff] %vm373_vm4, %v368_v42 }
 0x28d   :  { %v370_v44 = vpop.f32.mrf.mxu0 }
 0x28f   :  { %v468_v45 = vpop.f32.mrf.mxu0 }
 0x290   :  { %379 = vsyncpa [#allocation3], 1 }
 0x291   :  { %380 = vsyncpa [#allocation5], 1 }
 0x292   :  { %381 = vsyncpa [#allocation8], 1 }

</bundles_post_ra>
